<compile_context>
chip_gen: v7x
topology: tpu7x:2x2x1
jax: 0.10.0
libtpu: 0.0.40
codegen_flags: <defaults>
</compile_context>

<pallas_src>
import jax
import jax.numpy as jnp
from jax.experimental import pallas as pl
from jax.experimental.pallas import tpu as pltpu


def _net3_kernel(x_ref, w1_ref, b1_ref, w2_ref, b2_ref, w3_ref, b3_ref, o_ref):
    # Hot path: three MXU matmuls + VPU bias/ReLU, all VMEM-resident for this batch tile.
    x = x_ref[...]                                                    # [TB, F]
    h1 = jnp.dot(x, w1_ref[...], preferred_element_type=jnp.float32)  # [TB, H1]
    h1 = jnp.maximum(h1 + b1_ref[...], 0.0)                           # bias + ReLU
    # Dropout(p=0.5): eval-mode identity.
    h2 = jnp.dot(h1, w2_ref[...], preferred_element_type=jnp.float32)  # [TB, H2]
    h2 = jnp.maximum(h2 + b2_ref[...], 0.0)                            # bias + ReLU
    # Dropout(p=0.5): eval-mode identity.
    out = jnp.dot(h2, w3_ref[...], preferred_element_type=jnp.float32)  # [TB, O_pad]
    o_ref[...] = (out + b3_ref[...]).astype(o_ref.dtype)


def _round_up(n, m):
    return ((n + m - 1) // m) * m


def net_3_layer_forward(x, w1_t, b1, w2_t, b2, w3_t, b3, *, block_b=128):
    """x: [B, F]; w1_t: [F, H1], b1: [1, H1]; w2_t: [H1, H2], b2: [1, H2];
    w3_t: [H2, O], b3: [1, O]  ->  [B, O] (logits, no softmax)."""
    B, F = x.shape
    H1 = w1_t.shape[1]
    H2 = w2_t.shape[1]
    O = w3_t.shape[1]

    # Lane-dense output: zero-pad the logit dim to a multiple of 128 so stores are
    # full unmasked vst. Zero-padded weight columns / bias entries give exactly-zero
    # padded logits which are sliced off below (numerically identical).
    O_pad = _round_up(max(O, 128), 128)
    if O_pad != O:
        w3_t = jnp.pad(w3_t, ((0, 0), (0, O_pad - O)))
        b3 = jnp.pad(b3, ((0, 0), (0, O_pad - O)))

    # Batch tile: TB ~ 128 for production batches (amortizes MXU fill + per-step
    # overhead), rounded-up-to-8 for tiny batches. Pad B so the grid divides evenly;
    # padded rows are computed and discarded.
    TB = block_b if B >= block_b else _round_up(B, 8)
    B_pad = _round_up(B, TB)
    if B_pad != B:
        x = jnp.pad(x, ((0, B_pad - B), (0, 0)))

    grid = (B_pad // TB,)

    out = pl.pallas_call(
        _net3_kernel,
        out_shape=jax.ShapeDtypeStruct((B_pad, O_pad), jnp.float32),
        grid_spec=pltpu.PrefetchScalarGridSpec(
            num_scalar_prefetch=0,
            grid=grid,
            in_specs=[
                # x: tiled along batch, pipelined/double-buffered.
                pl.BlockSpec((TB, F), lambda i: (i, 0)),
                # Weights/biases: same block for every grid step -> stay VMEM-resident.
                pl.BlockSpec((F, H1), lambda i: (0, 0)),
                pl.BlockSpec((1, H1), lambda i: (0, 0)),
                pl.BlockSpec((H1, H2), lambda i: (0, 0)),
                pl.BlockSpec((1, H2), lambda i: (0, 0)),
                pl.BlockSpec((H2, O_pad), lambda i: (0, 0)),
                pl.BlockSpec((1, O_pad), lambda i: (0, 0)),
            ],
            out_specs=pl.BlockSpec((TB, O_pad), lambda i: (i, 0)),
        ),
        compiler_params=pltpu.CompilerParams(
            # Batch tiles are independent -> shard across both TCs on v7x.
            dimension_semantics=("parallel",),
            # Explicit, conservative VMEM budget (safe on v5e/v6e 128MiB and v7x 64MiB).
            # VMEM ~= 2*(TB*F + TB*O_pad)*4B + (F*H1 + H1*H2 + H2*O_pad + H1 + H2 + O_pad)*4B,
            # far below this limit at these shapes.
            vmem_limit_bytes=32 * 1024 * 1024,
        ),
    )(x, w1_t, b1, w2_t, b2, w3_t, b3)

    return out[:B, :O]


if __name__ == "__main__":
    # Small shapes consistent with Net_3_layer(n_feature, n_output):
    # hidden1 = n_feature // 4, hidden2 = n_feature // 16.
    B, n_feature, n_output = 10, 256, 16
    h1, h2 = n_feature // 4, n_feature // 16   # 64, 16

    key = jax.random.PRNGKey(0)
    kx, kw1, kb1, kw2, kb2, kw3, kb3 = jax.random.split(key, 7)

    x = jax.random.normal(kx, (B, n_feature), dtype=jnp.float32)

    # Deterministic synthetic parameters (PyTorch Linear shapes W1 [H1,F], W2 [H2,H1],
    # W3 [O,H2]), stored pre-transposed as [in, out] for the kernel.
    w1_t = jax.random.normal(kw1, (n_feature, h1), dtype=jnp.float32) / jnp.sqrt(n_feature)
    b1 = jax.random.normal(kb1, (1, h1), dtype=jnp.float32) / jnp.sqrt(n_feature)
    w2_t = jax.random.normal(kw2, (h1, h2), dtype=jnp.float32) / jnp.sqrt(h1)
    b2 = jax.random.normal(kb2, (1, h2), dtype=jnp.float32) / jnp.sqrt(h1)
    w3_t = jax.random.normal(kw3, (h2, n_output), dtype=jnp.float32) / jnp.sqrt(h2)
    b3 = jax.random.normal(kb3, (1, n_output), dtype=jnp.float32) / jnp.sqrt(h2)

    out = net_3_layer_forward(x, w1_t, b1, w2_t, b2, w3_t, b3)
    out = jax.block_until_ready(out)

    # Pure-JAX reference of the same (eval-mode) forward pass.
    r1 = jnp.maximum(x @ w1_t + b1, 0.0)
    r2 = jnp.maximum(r1 @ w2_t + b2, 0.0)
    ref = r2 @ w3_t + b3

    assert out.shape == (B, n_output)
    assert jnp.allclose(out, ref, atol=1e-4, rtol=1e-4), (
        float(jnp.max(jnp.abs(out - ref))))

    print("KERNEL_OK")
</pallas_src>

<mosaic_0001>
module attributes {stable_mosaic.version = 11 : i64} {
  func.func @_net3_kernel(%arg0: i32, %arg1: memref<16x256xf32, #tpu.memory_space<vmem>>, %arg2: memref<256x64xf32, #tpu.memory_space<vmem>>, %arg3: memref<1x64xf32, #tpu.memory_space<vmem>>, %arg4: memref<64x16xf32, #tpu.memory_space<vmem>>, %arg5: memref<1x16xf32, #tpu.memory_space<vmem>>, %arg6: memref<16x128xf32, #tpu.memory_space<vmem>>, %arg7: memref<1x128xf32, #tpu.memory_space<vmem>>, %arg8: memref<16x128xf32, #tpu.memory_space<vmem>>) attributes {dimension_semantics = [#tpu.dimension_semantics<parallel>], iteration_bounds = array<i64: 1>, scalar_prefetch = 0 : i64, scratch_operands = 0 : i64, tpu.core_type = #tpu.core_type<tc>, window_params = [{transform_indices = @transform_0, window_bounds = array<i64: 16, 256>}, {pipeline_mode = #tpu.pipeline_mode<synchronous>, transform_indices = @transform_1, window_bounds = array<i64: 256, 64>}, {pipeline_mode = #tpu.pipeline_mode<synchronous>, transform_indices = @transform_2, window_bounds = array<i64: 1, 64>}, {pipeline_mode = #tpu.pipeline_mode<synchronous>, transform_indices = @transform_3, window_bounds = array<i64: 64, 16>}, {pipeline_mode = #tpu.pipeline_mode<synchronous>, transform_indices = @transform_4, window_bounds = array<i64: 1, 16>}, {pipeline_mode = #tpu.pipeline_mode<synchronous>, transform_indices = @transform_5, window_bounds = array<i64: 16, 128>}, {pipeline_mode = #tpu.pipeline_mode<synchronous>, transform_indices = @transform_6, window_bounds = array<i64: 1, 128>}, {transform_indices = @transform_7, window_bounds = array<i64: 16, 128>}]} {
    %c0 = arith.constant 0 : index
    %c0_0 = arith.constant 0 : index
    %0 = vector.load %arg1[%c0, %c0_0] : memref<16x256xf32, #tpu.memory_space<vmem>>, vector<16x256xf32>
    %c0_1 = arith.constant 0 : index
    %c0_2 = arith.constant 0 : index
    %1 = vector.load %arg2[%c0_1, %c0_2] : memref<256x64xf32, #tpu.memory_space<vmem>>, vector<256x64xf32>
    %cst = arith.constant dense<0.000000e+00> : vector<16x64xf32>
    %2 = tpu.matmul %0, %1, %cst {dimension_numbers = #tpu.dot_dimension_numbers<[1], [0], [0], [1], [0, 0, 1, 1], [], []>} : vector<16x256xf32>, vector<256x64xf32>, vector<16x64xf32> -> vector<16x64xf32>
    %c0_3 = arith.constant 0 : index
    %c0_4 = arith.constant 0 : index
    %3 = vector.load %arg3[%c0_3, %c0_4] : memref<1x64xf32, #tpu.memory_space<vmem>>, vector<1x64xf32>
    %4 = vector.broadcast %3 : vector<1x64xf32> to vector<16x64xf32>
    %5 = arith.addf %2, %4 : vector<16x64xf32>
    %cst_5 = arith.constant 0.000000e+00 : f32
    %6 = vector.broadcast %cst_5 : f32 to vector<16x64xf32>
    %7 = arith.maximumf %5, %6 : vector<16x64xf32>
    %c0_6 = arith.constant 0 : index
    %c0_7 = arith.constant 0 : index
    %8 = vector.load %arg4[%c0_6, %c0_7] : memref<64x16xf32, #tpu.memory_space<vmem>>, vector<64x16xf32>
    %cst_8 = arith.constant dense<0.000000e+00> : vector<16x16xf32>
    %9 = tpu.matmul %7, %8, %cst_8 {dimension_numbers = #tpu.dot_dimension_numbers<[1], [0], [0], [1], [0, 0, 1, 1], [], []>} : vector<16x64xf32>, vector<64x16xf32>, vector<16x16xf32> -> vector<16x16xf32>
    %c0_9 = arith.constant 0 : index
    %c0_10 = arith.constant 0 : index
    %10 = vector.load %arg5[%c0_9, %c0_10] : memref<1x16xf32, #tpu.memory_space<vmem>>, vector<1x16xf32>
    %11 = vector.broadcast %10 : vector<1x16xf32> to vector<16x16xf32>
    %12 = arith.addf %9, %11 : vector<16x16xf32>
    %cst_11 = arith.constant 0.000000e+00 : f32
    %13 = vector.broadcast %cst_11 : f32 to vector<16x16xf32>
    %14 = arith.maximumf %12, %13 : vector<16x16xf32>
    %c0_12 = arith.constant 0 : index
    %c0_13 = arith.constant 0 : index
    %15 = vector.load %arg6[%c0_12, %c0_13] : memref<16x128xf32, #tpu.memory_space<vmem>>, vector<16x128xf32>
    %cst_14 = arith.constant dense<0.000000e+00> : vector<16x128xf32>
    %16 = tpu.matmul %14, %15, %cst_14 {dimension_numbers = #tpu.dot_dimension_numbers<[1], [0], [0], [1], [0, 0, 1, 1], [], []>} : vector<16x16xf32>, vector<16x128xf32>, vector<16x128xf32> -> vector<16x128xf32>
    %c0_15 = arith.constant 0 : index
    %c0_16 = arith.constant 0 : index
    %17 = vector.load %arg7[%c0_15, %c0_16] : memref<1x128xf32, #tpu.memory_space<vmem>>, vector<1x128xf32>
    %18 = vector.broadcast %17 : vector<1x128xf32> to vector<16x128xf32>
    %19 = arith.addf %16, %18 : vector<16x128xf32>
    %c0_17 = arith.constant 0 : index
    %c0_18 = arith.constant 0 : index
    %20 = vector.load %arg8[%c0_17, %c0_18] : memref<16x128xf32, #tpu.memory_space<vmem>>, vector<16x128xf32>
    tpu.vector_store %arg8[%c0_17, %c0_18], %19 {strides = array<i32>} : memref<16x128xf32, #tpu.memory_space<vmem>>, vector<16x128xf32>,
    return
  }
  func.func @transform_0(%arg0: i32) -> (i32, i32) {
    %c0_i32 = arith.constant 0 : i32
    %c0_i32_0 = arith.constant 0 : i32
    return %arg0, %c0_i32 : i32, i32
  }
  func.func @transform_1(%arg0: i32) -> (i32, i32) {
    %c0_i32 = arith.constant 0 : i32
    %c0_i32_0 = arith.constant 0 : i32
    %c0_i32_1 = arith.constant 0 : i32
    return %c0_i32, %c0_i32_0 : i32, i32
  }
  func.func @transform_2(%arg0: i32) -> (i32, i32) {
    %c0_i32 = arith.constant 0 : i32
    %c0_i32_0 = arith.constant 0 : i32
    %c0_i32_1 = arith.constant 0 : i32
    return %c0_i32, %c0_i32_0 : i32, i32
  }
  func.func @transform_3(%arg0: i32) -> (i32, i32) {
    %c0_i32 = arith.constant 0 : i32
    %c0_i32_0 = arith.constant 0 : i32
    %c0_i32_1 = arith.constant 0 : i32
    return %c0_i32, %c0_i32_0 : i32, i32
  }
  func.func @transform_4(%arg0: i32) -> (i32, i32) {
    %c0_i32 = arith.constant 0 : i32
    %c0_i32_0 = arith.constant 0 : i32
    %c0_i32_1 = arith.constant 0 : i32
    return %c0_i32, %c0_i32_0 : i32, i32
  }
  func.func @transform_5(%arg0: i32) -> (i32, i32) {
    %c0_i32 = arith.constant 0 : i32
    %c0_i32_0 = arith.constant 0 : i32
    %c0_i32_1 = arith.constant 0 : i32
    return %c0_i32, %c0_i32_0 : i32, i32
  }
  func.func @transform_6(%arg0: i32) -> (i32, i32) {
    %c0_i32 = arith.constant 0 : i32
    %c0_i32_0 = arith.constant 0 : i32
    %c0_i32_1 = arith.constant 0 : i32
    return %c0_i32, %c0_i32_0 : i32, i32
  }
  func.func @transform_7(%arg0: i32) -> (i32, i32) {
    %c0_i32 = arith.constant 0 : i32
    %c0_i32_0 = arith.constant 0 : i32
    return %arg0, %c0_i32 : i32, i32
  }
}

</mosaic_0001>

<bundles_post_ra>
// kernel: tpu_custom_call.1
= control target key start
LH: loop header
LB: loop body
LE: loop exit
PB: predicated region body
PF: predicated region fallthrough
CT: control target
= control target key end

     0   :  { %s721_s0 = inlined_call_operand.vmem [shape: f32[16,256], index: 0, kind: input, shape index: {}]   ;;  %s722_s1 = inlined_call_operand.vmem [shape: f32[256,64], index: 1, kind: input, shape index: {}]   ;;  %s723_s2 = inlined_call_operand.vmem [shape: f32[1,64], index: 2, kind: input, shape index: {}]   ;;  %s724_s3 = inlined_call_operand.vmem [shape: f32[64,16], index: 3, kind: input, shape index: {}]   ;;  %s725_s4 = inlined_call_operand.vmem [shape: f32[1,16], index: 4, kind: input, shape index: {}]   ;;  %s726_s5 = inlined_call_operand.vmem [shape: f32[16,128], index: 5, kind: input, shape index: {}]   ;;  %s727_s6 = inlined_call_operand.vmem [shape: f32[1,128], index: 6, kind: input, shape index: {}]   ;;  %s728_s7 = inlined_call_operand.hbm [shape: f32[16,128], index: 7, kind: output, shape index: {}]  }
   0x1   :  { %v47_v0 = vld [vmem:[%s722_s1 + $0x80] sm:$0xff]  ;;  %v48_v1 = vld [vmem:[%s722_s1 + $0x88] sm:$0xff]  ;;  %v49_v5 = vld [vmem:[%s722_s1 + $0x90] sm:$0xff] }
   0x2   :  { %v31_v2 = vld [vmem:[%s722_s1] sm:$0xff]  ;;  %v440_v3 = vpack.c.bf16 %v48_v1, %v47_v0  ;;  %v32_v4 = vld [vmem:[%s722_s1 + $0x8] sm:$0xff]  ;;  %v50_v6 = vld [vmem:[%s722_s1 + $0x98] sm:$0xff] }
   0x3   :  { %v442_v7 = vpack.c.bf16 %v32_v4, %v31_v2  ;;  %v444_v8 = vpack.c.bf16 %v50_v6, %v49_v5  ;;  %v33_v9 = vld [vmem:[%s722_s1 + $0x10] sm:$0xff]  ;;  %v34_v10 = vld [vmem:[%s722_s1 + $0x18] sm:$0xff]  ;;  %v51_v11 = vld [vmem:[%s722_s1 + $0xa0] sm:$0xff] }
   0x4   :  { %441 = vmatprep.subr.bf16.mxu0 %v440_v3  ;;  %v52_v12 = vld [vmem:[%s722_s1 + $0xa8] sm:$0xff]  ;;  %v446_v13 = vpack.c.bf16 %v34_v10, %v33_v9  ;;  %v35_v15 = vld [vmem:[%s722_s1 + $0x20] sm:$0xff]  ;;  %v53_v17 = vld [vmem:[%s722_s1 + $0xb0] sm:$0xff] }
   0x5   :  { %443 = vmatpush3.bf16.msra.mxu0 %v442_v7  ;;  %v448_v14 = vpack.c.bf16 %v52_v12, %v51_v11  ;;  %v36_v16 = vld [vmem:[%s722_s1 + $0x28] sm:$0xff]  ;;  %v54_v18 = vld [vmem:[%s722_s1 + $0xb8] sm:$0xff]  ;;  %v37_v21 = vld [vmem:[%s722_s1 + $0x30] sm:$0xff] }
   0x6   :  { %445 = vmatprep.subr.bf16.mxu0 %v444_v8  ;;  %v450_v19 = vpack.c.bf16 %v36_v16, %v35_v15  ;;  %v452_v20 = vpack.c.bf16 %v54_v18, %v53_v17  ;;  %v38_v22 = vld [vmem:[%s722_s1 + $0x38] sm:$0xff]  ;;  %v55_v23 = vld [vmem:[%s722_s1 + $0xc0] sm:$0xff]  ;;  %v56_v24 = vld [vmem:[%s722_s1 + $0xc8] sm:$0xff] }
   0x7   :  { %v28_v25 = vld [vmem:[%s721_s0 + $0x8] sm:$0xff]  ;;  %v454_v26 = vpack.c.bf16 %v38_v22, %v37_v21  ;;  %v147_v27 = vld [vmem:[%s724_s3] sm:$0xff] }
   0x8   :  { %134 = vmatprep.mubr.f32.mxu0 %v28_v25  ;;  %v148_v28 = vld [vmem:[%s724_s3 + $0x8] sm:$0xff] }
   0x9   :  { %447 = vmatpush3.bf16.msra.mxu0 %v446_v13 }
   0xa   :  { %449 = vmatprep.subr.bf16.mxu0 %v448_v14 }
   0xd   :  { %451 = vmatpush3.bf16.msra.mxu0 %v450_v19 }
   0xe   :  { %12 = vsyncpa [#allocation3], 0  ;;  %453 = vmatprep.subr.bf16.mxu0 %v452_v20  ;;  %v456_v29 = vpack.c.bf16 %v56_v24, %v55_v23  ;;  %v39_v30 = vld [vmem:[%s722_s1 + $0x40] sm:$0xff]  ;;  %v40_v31 = vld [vmem:[%s722_s1 + $0x48] sm:$0xff]  ;;  %v472_v32 = vpack.c.bf16 %v148_v28, %v147_v27  ;;  %vm162_vm0 = vcmask 523264   ;;  %vm255_vm1 = vcmask 130048  }
   0xf   :  { %v57_v33 = vld [vmem:[%s722_s1 + $0xd0] sm:$0xff]  ;;  %v58_v34 = vld [vmem:[%s722_s1 + $0xd8] sm:$0xff]  ;;  %v458_v35 = vpack.c.bf16 %v40_v31, %v39_v30  ;;  %v59_v39 = vld [vmem:[%s722_s1 + $0xe0] sm:$0xff] }
  0x10   :  { %473 = vmatprep.subr.bf16.mxu1 %v472_v32  ;;  %v460_v36 = vpack.c.bf16 %v58_v34, %v57_v33  ;;  %v41_v37 = vld [vmem:[%s722_s1 + $0x50] sm:$0xff]  ;;  %v42_v38 = vld [vmem:[%s722_s1 + $0x58] sm:$0xff]  ;;  %v60_v40 = vld [vmem:[%s722_s1 + $0xe8] sm:$0xff] }
  0x11   :  { %455 = vmatpush3.bf16.msra.mxu0 %v454_v26  ;;  %475 = vmatpush3.bf16.msra.mxu1 %v472_v32  ;;  %v462_v41 = vpack.c.bf16 %v42_v38, %v41_v37  ;;  %v464_v42 = vpack.c.bf16 %v60_v40, %v59_v39  ;;  %v43_v43 = vld [vmem:[%s722_s1 + $0x60] sm:$0xff]  ;;  %v44_v44 = vld [vmem:[%s722_s1 + $0x68] sm:$0xff]  ;;  %v61_v45 = vld [vmem:[%s722_s1 + $0xf0] sm:$0xff] }
  0x12   :  { %457 = vmatprep.subr.bf16.mxu0 %v456_v29  ;;  %v62_v46 = vld [vmem:[%s722_s1 + $0xf8] sm:$0xff]  ;;  %v466_v47 = vpack.c.bf16 %v44_v44, %v43_v43  ;;  %v45_v49 = vld [vmem:[%s722_s1 + $0x70] sm:$0xff]  ;;  %v27_v52 = vld [vmem:[%s721_s0] sm:$0xff] }
  0x13   :  { %v468_v48 = vpack.c.bf16 %v62_v46, %v61_v45  ;;  %v46_v50 = vld [vmem:[%s722_s1 + $0x78] sm:$0xff]  ;;  %v29_v54 = vld [vmem:[%s721_s0 + $0x10] sm:$0xff]  ;;  %v151_v58 = vld [vmem:[%s724_s3 + $0x20] sm:$0xff] }
  0x14   :  { %v470_v51 = vpack.c.bf16 %v46_v50, %v45_v49  ;;  %v30_v53 = vld [vmem:[%s721_s0 + $0x18] sm:$0xff]  ;;  %v149_v55 = vld [vmem:[%s724_s3 + $0x10] sm:$0xff]  ;;  %v152_v59 = vld [vmem:[%s724_s3 + $0x28] sm:$0xff] }
  0x15   :  { %459 = vmatpush3.bf16.msra.mxu0 %v458_v35  ;;  %v150_v56 = vld [vmem:[%s724_s3 + $0x18] sm:$0xff]  ;;  %v480_v60 = vpack.c.bf16 %v152_v59, %v151_v58  ;;  %v153_v61 = vld [vmem:[%s724_s3 + $0x30] sm:$0xff]  ;;  %v355_v2 = vld [vmem:[%s723_s2] ss:$0 sm:$0xff] }
  0x16   :  { %461 = vmatprep.subr.bf16.mxu0 %v460_v36  ;;  %v476_v57 = vpack.c.bf16 %v150_v56, %v149_v55  ;;  %v154_v62 = vld [vmem:[%s724_s3 + $0x38] sm:$0xff]  ;;  %v246_v11 = vld [vmem:[%s726_s5] sm:$0xff]  ;;  %v247_v12 = vld [vmem:[%s726_s5 + $0x8] sm:$0xff]  ;;  %s519_s5 = smov [#allocation2]  }
  0x17   :  { %v484_v63 = vpack.c.bf16 %v154_v62, %v153_v61  ;;  %v488_v13 = vpack.c.bf16 %v247_v12, %v246_v11  ;;  %v356_v14 = vld [vmem:[%s725_s4] ss:$0 sm:$0xff]  ;;  %s344_s26 = sshll.u32 %s519_s5, 4  ;;  %s345_s26 = int_to_ptr.vmem [resolvable:$true] %s344_s26 }
  0x18   :  { %477 = vmatprep.subr.bf16.mxu1 %v476_v57  ;;  %v359_v21 = vld [vmem:[%s727_s6] ss:$0 sm:$0xff]  ;;  %s495_s4 = scalar_lea.vmem %s345_s26, 256  ;;  %p500_p1 = scmp.lt.s32.totalorder %s345_s26, %s345_s26 }
  0x19   :  { %463 = vmatpush3.bf16.msra.mxu0 %v462_v41  ;;  %479 = vmatpush3.bf16.msra.mxu1 %v476_v57  ;;  %p496_p0 = scmp.ne.s32.totalorder %s345_s26, %s495_s4  ;;  %p501_p2 = scmp.lt.s32.totalorder %s495_s4, %s495_s4 }
  0x1a   :  { %465 = vmatprep.subr.bf16.mxu0 %v464_v42  ;;  %481 = vmatprep.subr.bf16.mxu1 %v480_v60 }
  0x1b   :  { %p502_p3 = por %p501_p2, %p500_p1 }
  0x1d   :  { %467 = vmatpush3.bf16.msra.mxu0 %v466_v47  ;;  %483 = vmatpush3.bf16.msra.mxu1 %v480_v60  ;;  %p503_p4 = pnand %p502_p3, %p496_p0 }
  0x1e   :  { %469 = vmatprep.subr.bf16.mxu0 %v468_v48  ;;  %485 = vmatprep.subr.bf16.mxu1 %v484_v63 }
  0x21   :  { %471 = vmatpush3.bf16.msra.mxu0 %v470_v51  ;;  %487 = vmatpush3.bf16.msra.mxu1 %v484_v63 }
  0x22   :  { %489 = vmatprep.subr.bf16.mxu1 %v488_v13 }
  0x24   :  { %135 = vmatmul.mubr.f32.vlgmr.msra.gmra.mrb[0].mxu0 %v27_v52 }
  0x25   :  { %139 = vmatprep.mubr.f32.mxu0 %v30_v53 }
  0x28   :  { %140 = vmatmul.mubr.f32.gmra.mrb[2].mxu0 %v29_v54 }
  0xf7   :  { %v394_v0 = vpop.f32.mrb[0].mxu0 }
  0xf8   :  { %v395_v1 = vpop.f32.mrb[1].mxu0 }
  0xf9   :  { %v396_v3 = vadd.f32 %v395_v1, %v394_v0 }
  0xfb   :  { %v397_v4 = vpop.f32.mrb[2].mxu0  ;;  %v137_v5 = vadd.f32 %v396_v3, %v355_v2 }
  0xfc   :  { %v398_v6 = vpop.f32.mrb[3].mxu0 }
  0xfd   :  { %v399_v7 = vadd.f32 %v398_v6, %v397_v4  ;;  %v145_v8 = vmax.f32 %v137_v5, 0.0 }
  0xff   :  { %v142_v9 = vadd.f32 %v399_v7, %v355_v2  ;;  %430 = vmatprep.mubr.msk.f32.mxu1 %vm162_vm0, %v145_v8 }
 0x101   :  { %v146_v10 = vmax.f32 %v142_v9, 0.0 }
 0x103   :  { %431 = vmatmul.mubr.msk.f32.vlgmr.msra.gmra.mrb[0].mxu1 %vm162_vm0, %v146_v10 }
 0x104   :  { %491 = vmatpush3.bf16.msra.mxu1 %v488_v13 }
 0x1d6   :  { %v432_v15 = vpop.f32.mrb[0].mxu1 }
 0x1d7   :  { %v241_v16 = vadd.f32 %v432_v15, %v356_v14  ;;  %v235_v17 = vpop.f32.mrb[1].mxu1 }
 0x1d8   :  { %v236_v18 = vadd.f32 %v356_v14, %v235_v17 }
 0x1d9   :  { %v245_v20 = vmax.f32 %v241_v16, 0.0 }
 0x1da   :  { %v244_v19 = vmax.f32 %v236_v18, 0.0 }
 0x1dc   :  { %437 = vmatprep.mubr.msk.f32.mxu1 %vm255_vm1, %v244_v19 }
 0x1dd   :  { %438 = vmatmul.mubr.msk.f32.vlgmr.msra.gmra.mrb[2].mxu1 %vm255_vm1, %v245_v20 }
 0x2b0   :  { %v439_v22 = vpop.f32.mrb[2].mxu1 }
 0x2b1   :  { %v334_v23 = vadd.f32 %v439_v22, %v359_v21  ;;  %v328_v24 = vpop.f32.mrb[3].mxu1 }
 0x2b2   :  { %v329_v25 = vadd.f32 %v359_v21, %v328_v24 }
 0x2b3   :  { %338 = vst [vmem:[#allocation2 + $0x8] sm:$0xff] %v334_v23 }
 0x2b4   :  { %337 = vst [vmem:[#allocation2] sm:$0xff] %v329_v25 }
 0x2b5   :  { %506 = shalt.err (!%p503_p4)
}
 0x2b6   :  { %s507_s6 = scalar_lea.hbm %s728_s7, 256 }
 0x2b7   :  { %p508_p5 = scmp.ne.s32.totalorder %s728_s7, %s507_s6  ;;  %p511_p6 = scmp.lt.u32.totalorder %s507_s6, %s728_s7 }
 0x2b9   :  { %p513_p7 = pnand %p511_p6, %p508_p5 }
 0x2bb   :  { %516 = shalt.err (!%p513_p7)
}
 0x2bc   :  { %s520_s9 = smov 128   ;;  %s521_s10 = smov 8  }
 0x2bd   :  { %350 = dma.vmem_to_hbm [thread:$0]  %s345_s26, 256, %s728_s7, [#allocation3], %s520_s9, %s520_s9, %s521_s10  }
 0x2be   :  { %517 = dma.done.wait [#allocation3], 256  }
 0x2bf   :  { %518 = vsyncadd [#allocation3], 4294967040 }
 0x2c0   :  { %354 = vsyncpa [#allocation3], 1 }

</bundles_post_ra>
